<compile_context>
chip_gen: v5e
topology: v5e:2x2
jax: 0.10.0
libtpu: 0.0.40
codegen_flags: <defaults>
</compile_context>

<pallas_src>
import functools
import math

import jax
import jax.numpy as jnp
from jax.experimental import pallas as pl
from jax.experimental.pallas import tpu as pltpu


def _transe_kernel(h_idx_ref, r_idx_ref, t_idx_ref,   # SMEM scalar prefetch: [B_pad] int32 each
                   ent_hbm, rel_hbm,                  # HBM refs (pl.ANY): [num_ent, D], [num_rel, D]
                   o_ref,                             # VMEM out tile: [TILE_B, 1] f32
                   h_buf, r_buf, t_buf,               # VMEM scratch: [TILE_B, D] f32 each
                   sem,                               # DMA semaphores: shape (3,)
                   *, tile_b):
    base = pl.program_id(0) * tile_b

    # ---- Fused gather: one row DMA per (h, r, t) index of this tile. -------
    @pl.loop(0, tile_b)
    def _issue(row):
        h = h_idx_ref[base + row]
        r = r_idx_ref[base + row]
        t = t_idx_ref[base + row]
        dst = pl.ds(row, 1)
        pltpu.make_async_copy(ent_hbm.at[pl.ds(h, 1), :], h_buf.at[dst, :], sem.at[0]).start()
        pltpu.make_async_copy(rel_hbm.at[pl.ds(r, 1), :], r_buf.at[dst, :], sem.at[1]).start()
        pltpu.make_async_copy(ent_hbm.at[pl.ds(t, 1), :], t_buf.at[dst, :], sem.at[2]).start()

    # Drain: every row copy has the identical (1, D) size, so waiting tile_b
    # times per semaphore with a same-shaped descriptor retires all of them.
    @pl.loop(0, tile_b)
    def _drain(row):
        del row
        pltpu.make_async_copy(ent_hbm.at[pl.ds(0, 1), :], h_buf.at[pl.ds(0, 1), :], sem.at[0]).wait()
        pltpu.make_async_copy(rel_hbm.at[pl.ds(0, 1), :], r_buf.at[pl.ds(0, 1), :], sem.at[1]).wait()
        pltpu.make_async_copy(ent_hbm.at[pl.ds(0, 1), :], t_buf.at[pl.ds(0, 1), :], sem.at[2]).wait()

    # ---- Score: -||e_h + e_r - e_t||_2 per row (VPU add/mul, XLU reduce, ---
    # ---- EUP sqrt) — trivially hidden under the gather DMA stream. ---------
    d = h_buf[...] + r_buf[...] - t_buf[...]          # [TILE_B, D]
    sq = jnp.sum(d * d, axis=1, keepdims=True)        # [TILE_B, 1]
    o_ref[...] = -jnp.sqrt(sq)


def transe_score(ent_embs, rel_embs, hs, rs, ts, *, tile_b=128):
    """-||ent[h] + rel[r] - ent[t]||_2 with the gather fused in-kernel. Returns [B, 1] f32."""
    B = hs.shape[0]
    D = ent_embs.shape[1]
    n_tiles = pl.cdiv(B, tile_b)
    b_pad = n_tiles * tile_b
    pad = b_pad - B

    # Pad index vectors with 0 (a valid row); padded scores are sliced off below.
    h_idx = jnp.pad(hs.astype(jnp.int32), (0, pad))
    r_idx = jnp.pad(rs.astype(jnp.int32), (0, pad))
    t_idx = jnp.pad(ts.astype(jnp.int32), (0, pad))

    kernel = functools.partial(_transe_kernel, tile_b=tile_b)

    # HBM traffic is dominated by the 3 * B * D gathered f32 rows (advisory).
    cost = pl.CostEstimate(
        flops=4 * b_pad * D,              # add + sub + square + reduce-add
        transcendentals=b_pad,            # one sqrt per row
        bytes_accessed=3 * b_pad * D * 4 + b_pad * 4,
    )

    out = pl.pallas_call(
        kernel,
        out_shape=jax.ShapeDtypeStruct((b_pad, 1), jnp.float32),
        grid_spec=pltpu.PrefetchScalarGridSpec(
            num_scalar_prefetch=3,                      # h_idx, r_idx, t_idx -> SMEM
            grid=(n_tiles,),
            in_specs=[
                pl.BlockSpec(memory_space=pl.ANY),      # ent_embs stays in HBM
                pl.BlockSpec(memory_space=pl.ANY),      # rel_embs stays in HBM
            ],
            out_specs=pl.BlockSpec((tile_b, 1), lambda i, h, r, t: (i, 0)),
            scratch_shapes=[
                pltpu.VMEM((tile_b, D), jnp.float32),   # gathered head rows
                pltpu.VMEM((tile_b, D), jnp.float32),   # gathered rel rows
                pltpu.VMEM((tile_b, D), jnp.float32),   # gathered tail rows
                pltpu.SemaphoreType.DMA((3,)),
            ],
        ),
        compiler_params=pltpu.CompilerParams(
            dimension_semantics=("parallel",),          # shards tiles over v7x's 2 TCs
            vmem_limit_bytes=32 * 1024 * 1024,          # explicit (v5e default is 16 MiB)
        ),
        cost_estimate=cost,
    )(h_idx, r_idx, t_idx, ent_embs, rel_embs)

    return out[:B]                                      # drop padded rows -> [B, 1]


class TransEPallas:
    """JAX/Pallas version of the PyTorch TransE module (forward only, L2 distance)."""

    def __init__(self, num_ent, num_rel, emb_dim, key):
        self.num_ent = num_ent
        self.num_rel = num_rel
        self.emb_dim = emb_dim
        k_ent, k_rel = jax.random.split(key)
        # xavier_uniform_: U(-a, a), a = sqrt(6 / (fan_in + fan_out))
        a_ent = math.sqrt(6.0 / (num_ent + emb_dim))
        a_rel = math.sqrt(6.0 / (num_rel + emb_dim))
        self.ent_embs = jax.random.uniform(
            k_ent, (num_ent, emb_dim), jnp.float32, -a_ent, a_ent)
        self.rel_embs = jax.random.uniform(
            k_rel, (num_rel, emb_dim), jnp.float32, -a_rel, a_rel)

    def __call__(self, batch):
        # batch: int32 [B, 3] of (h, r, t) indices.  The embedding gather now
        # happens inside the kernel (no jnp.take / extra HBM round trip here).
        return transe_score(
            self.ent_embs, self.rel_embs,
            batch[:, 0], batch[:, 1], batch[:, 2])


if __name__ == "__main__":
    root = jax.random.PRNGKey(0)
    k_model, k_h, k_r, k_t = jax.random.split(root, 4)

    num_ent, num_rel, emb_dim = 64, 16, 32
    batch_size = 8

    model = TransEPallas(num_ent, num_rel, emb_dim, k_model)

    batch = jnp.stack(
        [
            jax.random.randint(k_h, (batch_size,), 0, num_ent),
            jax.random.randint(k_r, (batch_size,), 0, num_rel),
            jax.random.randint(k_t, (batch_size,), 0, num_ent),
        ],
        axis=1,
    ).astype(jnp.int32)

    score = jax.block_until_ready(model(batch))

    # Plain-JAX reference (same math as the PyTorch forward).
    e_h = jnp.take(model.ent_embs, batch[:, 0], axis=0)
    e_r = jnp.take(model.rel_embs, batch[:, 1], axis=0)
    e_t = jnp.take(model.ent_embs, batch[:, 2], axis=0)
    ref = -jnp.sqrt(jnp.sum((e_h + e_r - e_t) ** 2, axis=1, keepdims=True))

    assert score.shape == (batch_size, 1), score.shape
    assert jnp.allclose(score, ref, atol=1e-5, rtol=1e-5)

    print("KERNEL_OK")
</pallas_src>

<mosaic_0001>
module attributes {stable_mosaic.version = 11 : i64} {
  func.func @_transe_kernel(%arg0: i32, %arg1: memref<128xi32, #tpu.memory_space<smem>>, %arg2: memref<128xi32, #tpu.memory_space<smem>>, %arg3: memref<128xi32, #tpu.memory_space<smem>>, %arg4: memref<64x32xf32, #tpu.memory_space<any>>, %arg5: memref<16x32xf32, #tpu.memory_space<any>>, %arg6: memref<128x1xf32, #tpu.memory_space<vmem>>, %arg7: memref<128x32xf32, #tpu.memory_space<vmem>>, %arg8: memref<128x32xf32, #tpu.memory_space<vmem>>, %arg9: memref<128x32xf32, #tpu.memory_space<vmem>>, %arg10: memref<3x!tpu.dma_semaphore, #tpu.memory_space<semaphore_mem>>) attributes {dimension_semantics = [#tpu.dimension_semantics<parallel>], iteration_bounds = array<i64: 1>, scalar_prefetch = 3 : i64, scratch_operands = 4 : i64, tpu.core_type = #tpu.core_type<tc>, window_params = [{}, {}, {transform_indices = @transform_2, window_bounds = array<i64: 128, 1>}]} {
    %c128_i32 = arith.constant 128 : i32
    %0 = arith.muli %arg0, %c128_i32 : i32
    %c0_i32 = arith.constant 0 : i32
    %c128_i32_0 = arith.constant 128 : i32
    %1 = arith.addi %c0_i32, %c128_i32_0 : i32
    %c1_i32 = arith.constant 1 : i32
    scf.for %arg11 = %c0_i32 to %1 step %c1_i32  : i32 {
      %c1_i32_13 = arith.constant 1 : i32
      %15 = arith.muli %arg11, %c1_i32_13 : i32
      %c0_i32_14 = arith.constant 0 : i32
      %16 = arith.addi %c0_i32_14, %15 : i32
      %17 = arith.addi %0, %16 : i32
      %18 = arith.index_cast %17 : i32 to index
      %19 = memref.load %arg1[%18] : memref<128xi32, #tpu.memory_space<smem>>
      %20 = arith.addi %0, %16 : i32
      %21 = arith.index_cast %20 : i32 to index
      %22 = memref.load %arg2[%21] : memref<128xi32, #tpu.memory_space<smem>>
      %23 = arith.addi %0, %16 : i32
      %24 = arith.index_cast %23 : i32 to index
      %25 = memref.load %arg3[%24] : memref<128xi32, #tpu.memory_space<smem>>
      %c0_i32_15 = arith.constant 0 : i32
      %c0_i32_16 = arith.constant 0 : i32
      %26 = tpu.memref_slice %arg4[%19, %c0_i32_16] : memref<64x32xf32, #tpu.memory_space<any>> -> memref<1x32xf32, #tpu.memory_space<any>>
      %c0_i32_17 = arith.constant 0 : i32
      %27 = tpu.memref_slice %arg7[%16, %c0_i32_17] : memref<128x32xf32, #tpu.memory_space<vmem>> -> memref<1x32xf32, #tpu.memory_space<vmem>>
      %28 = tpu.memref_slice %arg10[%c0_i32_15] : memref<3x!tpu.dma_semaphore, #tpu.memory_space<semaphore_mem>> -> memref<1x!tpu.dma_semaphore, #tpu.memory_space<semaphore_mem>>
      %29 = tpu.memref_squeeze %28 : memref<1x!tpu.dma_semaphore, #tpu.memory_space<semaphore_mem>> -> memref<!tpu.dma_semaphore, #tpu.memory_space<semaphore_mem>>
      tpu.enqueue_dma source(%26 : memref<1x32xf32, #tpu.memory_space<any>>) target(%27 : memref<1x32xf32, #tpu.memory_space<vmem>>) target_semaphore(%29 : memref<!tpu.dma_semaphore, #tpu.memory_space<semaphore_mem>>)
      %c1_i32_18 = arith.constant 1 : i32
      %c0_i32_19 = arith.constant 0 : i32
      %30 = tpu.memref_slice %arg5[%22, %c0_i32_19] : memref<16x32xf32, #tpu.memory_space<any>> -> memref<1x32xf32, #tpu.memory_space<any>>
      %c0_i32_20 = arith.constant 0 : i32
      %31 = tpu.memref_slice %arg8[%16, %c0_i32_20] : memref<128x32xf32, #tpu.memory_space<vmem>> -> memref<1x32xf32, #tpu.memory_space<vmem>>
      %32 = tpu.memref_slice %arg10[%c1_i32_18] : memref<3x!tpu.dma_semaphore, #tpu.memory_space<semaphore_mem>> -> memref<1x!tpu.dma_semaphore, #tpu.memory_space<semaphore_mem>>
      %33 = tpu.memref_squeeze %32 : memref<1x!tpu.dma_semaphore, #tpu.memory_space<semaphore_mem>> -> memref<!tpu.dma_semaphore, #tpu.memory_space<semaphore_mem>>
      tpu.enqueue_dma source(%30 : memref<1x32xf32, #tpu.memory_space<any>>) target(%31 : memref<1x32xf32, #tpu.memory_space<vmem>>) target_semaphore(%33 : memref<!tpu.dma_semaphore, #tpu.memory_space<semaphore_mem>>)
      %c2_i32 = arith.constant 2 : i32
      %c0_i32_21 = arith.constant 0 : i32
      %34 = tpu.memref_slice %arg4[%25, %c0_i32_21] : memref<64x32xf32, #tpu.memory_space<any>> -> memref<1x32xf32, #tpu.memory_space<any>>
      %c0_i32_22 = arith.constant 0 : i32
      %35 = tpu.memref_slice %arg9[%16, %c0_i32_22] : memref<128x32xf32, #tpu.memory_space<vmem>> -> memref<1x32xf32, #tpu.memory_space<vmem>>
      %36 = tpu.memref_slice %arg10[%c2_i32] : memref<3x!tpu.dma_semaphore, #tpu.memory_space<semaphore_mem>> -> memref<1x!tpu.dma_semaphore, #tpu.memory_space<semaphore_mem>>
      %37 = tpu.memref_squeeze %36 : memref<1x!tpu.dma_semaphore, #tpu.memory_space<semaphore_mem>> -> memref<!tpu.dma_semaphore, #tpu.memory_space<semaphore_mem>>
      tpu.enqueue_dma source(%34 : memref<1x32xf32, #tpu.memory_space<any>>) target(%35 : memref<1x32xf32, #tpu.memory_space<vmem>>) target_semaphore(%37 : memref<!tpu.dma_semaphore, #tpu.memory_space<semaphore_mem>>)
    }
    %c128_i32_1 = arith.constant 128 : i32
    %c0_i32_2 = arith.constant 0 : i32
    %c128_i32_3 = arith.constant 128 : i32
    %2 = arith.addi %c0_i32_2, %c128_i32_3 : i32
    %c1_i32_4 = arith.constant 1 : i32
    scf.for %arg11 = %c0_i32_2 to %2 step %c1_i32_4  : i32 {
      %c0_i32_13 = arith.constant 0 : i32
      %c0_i32_14 = arith.constant 0 : i32
      %c0_i32_15 = arith.constant 0 : i32
      %15 = tpu.memref_slice %arg4[%c0_i32_14, %c0_i32_15] : memref<64x32xf32, #tpu.memory_space<any>> -> memref<1x32xf32, #tpu.memory_space<any>>
      %c0_i32_16 = arith.constant 0 : i32
      %c0_i32_17 = arith.constant 0 : i32
      %16 = tpu.memref_slice %arg7[%c0_i32_16, %c0_i32_17] : memref<128x32xf32, #tpu.memory_space<vmem>> -> memref<1x32xf32, #tpu.memory_space<vmem>>
      %17 = tpu.memref_slice %arg10[%c0_i32_13] : memref<3x!tpu.dma_semaphore, #tpu.memory_space<semaphore_mem>> -> memref<1x!tpu.dma_semaphore, #tpu.memory_space<semaphore_mem>>
      %18 = tpu.memref_squeeze %17 : memref<1x!tpu.dma_semaphore, #tpu.memory_space<semaphore_mem>> -> memref<!tpu.dma_semaphore, #tpu.memory_space<semaphore_mem>>
      tpu.wait_dma2 semaphore(%18 : memref<!tpu.dma_semaphore, #tpu.memory_space<semaphore_mem>>) src(%15 : memref<1x32xf32, #tpu.memory_space<any>>) dst(%16 : memref<1x32xf32, #tpu.memory_space<vmem>>)
      %c1_i32_18 = arith.constant 1 : i32
      %c0_i32_19 = arith.constant 0 : i32
      %c0_i32_20 = arith.constant 0 : i32
      %19 = tpu.memref_slice %arg5[%c0_i32_19, %c0_i32_20] : memref<16x32xf32, #tpu.memory_space<any>> -> memref<1x32xf32, #tpu.memory_space<any>>
      %c0_i32_21 = arith.constant 0 : i32
      %c0_i32_22 = arith.constant 0 : i32
      %20 = tpu.memref_slice %arg8[%c0_i32_21, %c0_i32_22] : memref<128x32xf32, #tpu.memory_space<vmem>> -> memref<1x32xf32, #tpu.memory_space<vmem>>
      %21 = tpu.memref_slice %arg10[%c1_i32_18] : memref<3x!tpu.dma_semaphore, #tpu.memory_space<semaphore_mem>> -> memref<1x!tpu.dma_semaphore, #tpu.memory_space<semaphore_mem>>
      %22 = tpu.memref_squeeze %21 : memref<1x!tpu.dma_semaphore, #tpu.memory_space<semaphore_mem>> -> memref<!tpu.dma_semaphore, #tpu.memory_space<semaphore_mem>>
      tpu.wait_dma2 semaphore(%22 : memref<!tpu.dma_semaphore, #tpu.memory_space<semaphore_mem>>) src(%19 : memref<1x32xf32, #tpu.memory_space<any>>) dst(%20 : memref<1x32xf32, #tpu.memory_space<vmem>>)
      %c2_i32 = arith.constant 2 : i32
      %c0_i32_23 = arith.constant 0 : i32
      %c0_i32_24 = arith.constant 0 : i32
      %23 = tpu.memref_slice %arg4[%c0_i32_23, %c0_i32_24] : memref<64x32xf32, #tpu.memory_space<any>> -> memref<1x32xf32, #tpu.memory_space<any>>
      %c0_i32_25 = arith.constant 0 : i32
      %c0_i32_26 = arith.constant 0 : i32
      %24 = tpu.memref_slice %arg9[%c0_i32_25, %c0_i32_26] : memref<128x32xf32, #tpu.memory_space<vmem>> -> memref<1x32xf32, #tpu.memory_space<vmem>>
      %25 = tpu.memref_slice %arg10[%c2_i32] : memref<3x!tpu.dma_semaphore, #tpu.memory_space<semaphore_mem>> -> memref<1x!tpu.dma_semaphore, #tpu.memory_space<semaphore_mem>>
      %26 = tpu.memref_squeeze %25 : memref<1x!tpu.dma_semaphore, #tpu.memory_space<semaphore_mem>> -> memref<!tpu.dma_semaphore, #tpu.memory_space<semaphore_mem>>
      tpu.wait_dma2 semaphore(%26 : memref<!tpu.dma_semaphore, #tpu.memory_space<semaphore_mem>>) src(%23 : memref<1x32xf32, #tpu.memory_space<any>>) dst(%24 : memref<1x32xf32, #tpu.memory_space<vmem>>)
    }
    %c0 = arith.constant 0 : index
    %c0_5 = arith.constant 0 : index
    %3 = vector.load %arg7[%c0, %c0_5] : memref<128x32xf32, #tpu.memory_space<vmem>>, vector<128x32xf32>
    %c0_6 = arith.constant 0 : index
    %c0_7 = arith.constant 0 : index
    %4 = vector.load %arg8[%c0_6, %c0_7] : memref<128x32xf32, #tpu.memory_space<vmem>>, vector<128x32xf32>
    %5 = arith.addf %3, %4 : vector<128x32xf32>
    %c0_8 = arith.constant 0 : index
    %c0_9 = arith.constant 0 : index
    %6 = vector.load %arg9[%c0_8, %c0_9] : memref<128x32xf32, #tpu.memory_space<vmem>>, vector<128x32xf32>
    %7 = arith.subf %5, %6 : vector<128x32xf32>
    %8 = arith.mulf %7, %7 : vector<128x32xf32>
    %cst = arith.constant dense<0.000000e+00> : vector<128xf32>
    %9 = vector.multi_reduction <add>, %8, %cst [1] : vector<128x32xf32> to vector<128xf32>
    %10 = vector.shape_cast %9 : vector<128xf32> to vector<128x1xf32>
    %11 = math.sqrt %10 : vector<128x1xf32>
    %cst_10 = arith.constant 0.000000e+00 : f32
    %12 = vector.broadcast %cst_10 : f32 to vector<128x1xf32>
    %13 = arith.subf %12, %11 : vector<128x1xf32>
    %c0_11 = arith.constant 0 : index
    %c0_12 = arith.constant 0 : index
    %14 = vector.load %arg6[%c0_11, %c0_12] : memref<128x1xf32, #tpu.memory_space<vmem>>, vector<128x1xf32>
    tpu.vector_store %arg6[%c0_11, %c0_12], %13 {strides = array<i32>} : memref<128x1xf32, #tpu.memory_space<vmem>>, vector<128x1xf32>,
    return
  }
  func.func @transform_2(%arg0: i32, %arg1: memref<128xi32, #tpu.memory_space<smem>>, %arg2: memref<128xi32, #tpu.memory_space<smem>>, %arg3: memref<128xi32, #tpu.memory_space<smem>>) -> (i32, i32) {
    %c0_i32 = arith.constant 0 : i32
    %c0_i32_0 = arith.constant 0 : i32
    return %arg0, %c0_i32 : i32, i32
  }
}

</mosaic_0001>

<bundles_post_ra>
// kernel: tpu_custom_call.1
= control target key start
LH: loop header
LB: loop body
LE: loop exit
PB: predicated region body
PF: predicated region fallthrough
CT: control target
= control target key end

     0   :  { %s700_s24 = smov [#allocation7]   ;;  %s701_s25 = smov [#allocation8]   ;;  %s1000_s0 = inlined_call_operand.vmem [shape: s32[128], index: 0, kind: input, shape index: {}]   ;;  %s1001_s3 = inlined_call_operand.vmem [shape: f32[64,32], index: 3, kind: input, shape index: {}]   ;;  %s1002_s4 = inlined_call_operand.vmem [shape: f32[16,32], index: 4, kind: input, shape index: {}]   ;;  %s1003_s5 = inlined_call_operand.vmem [shape: f32[128,1], index: 5, kind: output, shape index: {}]   ;;  %s1004_s1 = inlined_call_operand.vmem [shape: s32[128], index: 1, kind: input, shape index: {}]   ;;  %s1005_s2 = inlined_call_operand.vmem [shape: s32[128], index: 2, kind: input, shape index: {}]  }
   0x1   :  { %s11_s20 = sshll.u32 %s1000_s0, 4  ;;  %s16_s23 = sshll.u32 %s1004_s1, 4  ;;  %s12_s20 = int_to_ptr.vmem [resolvable:$true] %s11_s20  ;;  %s17_s23 = int_to_ptr.vmem [resolvable:$true] %s16_s23 }
   0x2   :  { %14 = dma.vmem_to_smem %s12_s20, 16, %s700_s24, [#allocation6] }
   0x3   :  { %19 = dma.vmem_to_smem %s17_s23, 16, %s701_s25, [#allocation6] }
   0x4   :  { %s21_s28 = sshll.u32 %s1005_s2, 4  ;;  %s702_s29 = smov [#allocation9]   ;;  %s22_s28 = int_to_ptr.vmem [resolvable:$true] %s21_s28 }
   0x5   :  { %24 = dma.vmem_to_smem %s22_s28, 16, %s702_s29, [#allocation6] }
   0x6   :  { %684 = dma.done.wait [#allocation6], 48 }
   0x7   :  { %685 = vsyncadd [#allocation6], 4294967248 }
   0x8   :  { %27 = sfence }
   0x9   :  { %s692_s0 = smov 0  }
   0xa LB: > { %s36_s1 = sld [smem:[#allocation7 + %s694_s0]]  ;;  %s40_s10 = scalar_lea.vmem [#allocation2], %s694_s0  ;;  %s694_s0 = sphi %s692_s0, %s34_s0  }
   0xb   : > { %s37_s30 = sld [smem:[#allocation8 + %s694_s0]] }
   0xc   : > { %s38_s6 = sld [smem:[#allocation9 + %s694_s0]] }
  0x10   : > { %s39_s9 = scalar_lea.vmem %s1001_s3, %s36_s1 }
  0x11   : > { %v55_v0 = vld [vmem:[%s39_s9] sm:$0x1] }
  0x12   : > { %56 = vst [vmem:[%s40_s10] sm:$0x1] %v55_v0 }
  0x13   : > { %74 = vsyncadd [#allocation5], 16  ;;  %s75_s12 = scalar_lea.vmem %s1002_s4, %s37_s30  ;;  %s76_s13 = scalar_lea.vmem [#allocation3], %s694_s0 }
  0x14   : > { %v92_v1 = vld [vmem:[%s75_s12] sm:$0x1] }
  0x15   : > { %93 = vst [vmem:[%s76_s13] sm:$0x1] %v92_v1 }
  0x16   : > { %111 = vsyncadd [#allocation5 + $0x1], 16  ;;  %s112_s16 = scalar_lea.vmem %s1001_s3, %s38_s6  ;;  %s113_s17 = scalar_lea.vmem [#allocation4], %s694_s0 }
  0x17   : > { %v129_v2 = vld [vmem:[%s112_s16] sm:$0x1] }
  0x18   : > { %130 = vst [vmem:[%s113_s17] sm:$0x1] %v129_v2 }
  0x19   : > { %148 = vsyncadd [#allocation5 + $0x2], 16  ;;  %s34_s0 = sadd.s32 1, %s694_s0  }
  0x1a   : > { %p31_p0 = scmp.ge.s32.totalorder %s34_s0, 128  }
  0x1b   :  { %s696_s18 = smov (%p31_p0), 0  }
  0x1c   :  { %33 = sbr.rel (!%p31_p0) target bundleno = 10 (0xa), region = 148 }
  0x21 LB: > { %686 = dma.done.wait [#allocation5], 16  ;;  %s698_s18 = sphi %s696_s18, %s154_s18  }
  0x22   : > { %687 = vsyncadd [#allocation5], 4294967280 }
  0x23   : > { %688 = dma.done.wait [#allocation5 + $0x1], 16 }
  0x24   : > { %689 = vsyncadd [#allocation5 + $0x1], 4294967280 }
  0x25   : > { %690 = dma.done.wait [#allocation5 + $0x2], 16 }
  0x26   : > { %691 = vsyncadd [#allocation5 + $0x2], 4294967280  ;;  %s154_s18 = sadd.s32 1, %s698_s18  }
  0x27   : > { %p151_p1 = scmp.ge.s32.totalorder %s154_s18, 128  }
  0x28   :  { %v168_v3 = vld [vmem:[#allocation2 + $0x20] sm:$0xff] (%p151_p1)  ;;  %v166_v7 = vld [vmem:[#allocation2 + $0x10] sm:$0xff] (%p151_p1)  ;;  %v169_v16 = vld [vmem:[#allocation2 + $0x28] sm:$0xff] (%p151_p1)  ;;  %vm260_vm0 = vcmask (%p151_p1), 261120   ;;  %vm517_vm1 = vcmask (%p151_p1), 7168  }
  0x29   :  { %153 = sbr.rel (!%p151_p1) target bundleno = 33 (0x21), region = 159  ;;  %v184_v4 = vld [vmem:[#allocation3 + $0x20] sm:$0xff] (%p151_p1)  ;;  %v182_v8 = vld [vmem:[#allocation3 + $0x10] sm:$0xff] (%p151_p1)  ;;  %v185_v17 = vld [vmem:[#allocation3 + $0x28] sm:$0xff] (%p151_p1) }
  0x2a   :  { %v216_v5 = vld [vmem:[#allocation4 + $0x20] sm:$0xff] (%p151_p1)  ;;  %v200_v6 = vadd.f32 (%p151_p1), %v184_v4, %v168_v3  ;;  %v214_v9 = vld [vmem:[#allocation4 + $0x10] sm:$0xff] (%p151_p1)  ;;  %v198_v10 = vadd.f32 (%p151_p1), %v182_v8, %v166_v7  ;;  %v217_v18 = vld [vmem:[#allocation4 + $0x28] sm:$0xff] (%p151_p1)  ;;  %v201_v20 = vadd.f32 (%p151_p1), %v185_v17, %v169_v16 }
  0x2b   :  { %v164_v11 = vld [vmem:[#allocation2] sm:$0xff] (%p151_p1)  ;;  %v167_v21 = vld [vmem:[#allocation2 + $0x18] sm:$0xff] (%p151_p1)  ;;  %v165_v27 = vld [vmem:[#allocation2 + $0x8] sm:$0xff] (%p151_p1) }
  0x2c   :  { %v180_v12 = vld [vmem:[#allocation3] sm:$0xff] (%p151_p1)  ;;  %v232_v14 = vsub.f32 (%p151_p1), %v200_v6, %v216_v5  ;;  %v230_v19 = vsub.f32 (%p151_p1), %v198_v10, %v214_v9  ;;  %v183_v22 = vld [vmem:[#allocation3 + $0x18] sm:$0xff] (%p151_p1)  ;;  %v181_v28 = vld [vmem:[#allocation3 + $0x8] sm:$0xff] (%p151_p1)  ;;  %v233_v31 = vsub.f32 (%p151_p1), %v201_v20, %v217_v18 }
  0x2d   :  { %v212_v13 = vld [vmem:[#allocation4] sm:$0xff] (%p151_p1)  ;;  %v196_v15 = vadd.f32 (%p151_p1), %v180_v12, %v164_v11  ;;  %v215_v23 = vld [vmem:[#allocation4 + $0x18] sm:$0xff] (%p151_p1)  ;;  %v199_v26 = vadd.f32 (%p151_p1), %v183_v22, %v167_v21  ;;  %v213_v29 = vld [vmem:[#allocation4 + $0x8] sm:$0xff] (%p151_p1)  ;;  %v197_v32 = vadd.f32 (%p151_p1), %v181_v28, %v165_v27 }
  0x2e   :  { %v248_v24 = vmul.f32 %v232_v14, %v232_v14  ;;  %v246_v30 = vmul.f32 %v230_v19, %v230_v19  ;;  %v172_v33 = vld [vmem:[#allocation2 + $0x40] sm:$0xff]  ;;  %v171_v38 = vld [vmem:[#allocation2 + $0x38] sm:$0xff]  ;;  %v170_v42 = vld [vmem:[#allocation2 + $0x30] sm:$0xff]  ;;  %v249_v45 = vmul.f32 %v233_v31, %v233_v31 }
  0x2f   :  { %v228_v25 = vsub.f32 %v196_v15, %v212_v13  ;;  %v188_v34 = vld [vmem:[#allocation3 + $0x40] sm:$0xff]  ;;  %v231_v37 = vsub.f32 %v199_v26, %v215_v23  ;;  %v187_v39 = vld [vmem:[#allocation3 + $0x38] sm:$0xff]  ;;  %v229_v41 = vsub.f32 %v197_v32, %v213_v29  ;;  %v186_v43 = vld [vmem:[#allocation3 + $0x30] sm:$0xff] }
  0x30   :  { %v273_v35 = vsel %vm260_vm0, %v248_v24, 0.0  ;;  %v267_v40 = vsel %vm260_vm0, %v246_v30, 0.0  ;;  %v204_v46 = vadd.f32 %v188_v34, %v172_v33  ;;  %v220_v48 = vld [vmem:[#allocation4 + $0x40] sm:$0xff]  ;;  %v203_v49 = vadd.f32 %v187_v39, %v171_v38  ;;  %v219_v51 = vld [vmem:[#allocation4 + $0x38] sm:$0xff]  ;;  %v218_v53 = vld [vmem:[#allocation4 + $0x30] sm:$0xff] }
  0x31   :  { %v244_v36 = vmul.f32 %v228_v25, %v228_v25  ;;  %274 = vadd.xlane.f32.xlu2 %v273_v35  ;;  %268 = vadd.xlane.f32.xlu1 %v267_v40  ;;  %v247_v47 = vmul.f32 %v231_v37, %v231_v37  ;;  %v245_v50 = vmul.f32 %v229_v41, %v229_v41  ;;  %v276_v54 = vsel %vm260_vm0, %v249_v45, 0.0  ;;  %v175_v58 = vld [vmem:[#allocation2 + $0x58] sm:$0xff]  ;;  %v174_v62 = vld [vmem:[#allocation2 + $0x50] sm:$0xff]  ;;  %v173_v0 = vld [vmem:[#allocation2 + $0x48] sm:$0xff] }
  0x32   :  { %v202_v52 = vadd.f32 %v186_v43, %v170_v42  ;;  %v236_v55 = vsub.f32 %v204_v46, %v220_v48  ;;  %v235_v57 = vsub.f32 %v203_v49, %v219_v51  ;;  %v191_v59 = vld [vmem:[#allocation3 + $0x58] sm:$0xff]  ;;  %v190_v63 = vld [vmem:[#allocation3 + $0x50] sm:$0xff]  ;;  %v189_v1 = vld [vmem:[#allocation3 + $0x48] sm:$0xff] }
  0x33   :  { %v261_v44 = vsel %vm260_vm0, %v244_v36, 0.0  ;;  %v270_v56 = vsel %vm260_vm0, %v247_v47, 0.0  ;;  %v264_v60 = vsel %vm260_vm0, %v245_v50, 0.0  ;;  %v207_v3 = vadd.f32 %v191_v59, %v175_v58  ;;  %v223_v5 = vld [vmem:[#allocation4 + $0x58] sm:$0xff]  ;;  %v222_v8 = vld [vmem:[#allocation4 + $0x50] sm:$0xff]  ;;  %v221_v10 = vld [vmem:[#allocation4 + $0x48] sm:$0xff] }
  0x34   :  { %262 = vadd.xlane.f32.xlu0 %v261_v44  ;;  %v234_v61 = vsub.f32 %v202_v52, %v218_v53  ;;  %v252_v2 = vmul.f32 %v236_v55, %v236_v55  ;;  %v251_v4 = vmul.f32 %v235_v57, %v235_v57  ;;  %v206_v6 = vadd.f32 %v190_v63, %v174_v62  ;;  %v178_v15 = vld [vmem:[#allocation2 + $0x70] sm:$0xff]  ;;  %v177_v19 = vld [vmem:[#allocation2 + $0x68] sm:$0xff]  ;;  %v176_v21 = vld [vmem:[#allocation2 + $0x60] sm:$0xff] }
  0x35   :  { %v205_v9 = vadd.f32 %v189_v1, %v173_v0  ;;  %v239_v12 = vsub.f32 %v207_v3, %v223_v5  ;;  %v194_v16 = vld [vmem:[#allocation3 + $0x70] sm:$0xff]  ;;  %v193_v20 = vld [vmem:[#allocation3 + $0x68] sm:$0xff]  ;;  %v192_v22 = vld [vmem:[#allocation3 + $0x60] sm:$0xff] }
  0x36   :  { %v250_v7 = vmul.f32 %v234_v61, %v234_v61  ;;  %v285_v11 = vsel %vm260_vm0, %v252_v2, 0.0  ;;  %v282_v13 = vsel %vm260_vm0, %v251_v4, 0.0  ;;  %v238_v14 = vsub.f32 %v206_v6, %v222_v8  ;;  %v226_v26 = vld [vmem:[#allocation4 + $0x70] sm:$0xff]  ;;  %v225_v29 = vld [vmem:[#allocation4 + $0x68] sm:$0xff]  ;;  %v224_v31 = vld [vmem:[#allocation4 + $0x60] sm:$0xff] }
  0x37   :  { %v237_v18 = vsub.f32 %v205_v9, %v221_v10  ;;  %v255_v23 = vmul.f32 %v239_v12, %v239_v12  ;;  %v210_v24 = vadd.f32 %v194_v16, %v178_v15  ;;  %v209_v27 = vadd.f32 %v193_v20, %v177_v19  ;;  %v179_v38 = vld [vmem:[#allocation2 + $0x78] sm:$0xff] }
  0x38   :  { %v279_v17 = vsel %vm260_vm0, %v250_v7, 0.0  ;;  %v254_v25 = vmul.f32 %v238_v14, %v238_v14  ;;  %v208_v30 = vadd.f32 %v192_v22, %v176_v21  ;;  %v195_v39 = vld [vmem:[#allocation3 + $0x78] sm:$0xff] }
  0x39   :  { %277 = vadd.xlane.f32.xlu2 %v276_v54  ;;  %271 = vadd.xlane.f32.xlu1 %v270_v56  ;;  %v253_v28 = vmul.f32 %v237_v18, %v237_v18  ;;  %v294_v32 = vsel %vm260_vm0, %v255_v23, 0.0  ;;  %v242_v33 = vsub.f32 %v210_v24, %v226_v26  ;;  %v241_v35 = vsub.f32 %v209_v27, %v225_v29  ;;  %v227_v44 = vld [vmem:[#allocation4 + $0x78] sm:$0xff] }
  0x3a   :  { %v291_v34 = vsel %vm260_vm0, %v254_v25, 0.0  ;;  %v240_v37 = vsub.f32 %v208_v30, %v224_v31  ;;  %v211_v43 = vadd.f32 %v195_v39, %v179_v38 }
  0x3b   :  { %v288_v36 = vsel %vm260_vm0, %v253_v28, 0.0  ;;  %v258_v40 = vmul.f32 %v242_v33, %v242_v33  ;;  %v257_v41 = vmul.f32 %v241_v35, %v241_v35 }
  0x3c   :  { %265 = vadd.xlane.f32.xlu0 %v264_v60  ;;  %v256_v42 = vmul.f32 %v240_v37, %v240_v37  ;;  %v243_v48 = vsub.f32 %v211_v43, %v227_v44 }
  0x3d   :  { %v303_v45 = vsel %vm260_vm0, %v258_v40, 0.0  ;;  %v300_v46 = vsel %vm260_vm0, %v257_v41, 0.0 }
  0x3e   :  { %v297_v47 = vsel %vm260_vm0, %v256_v42, 0.0  ;;  %v259_v49 = vmul.f32 %v243_v48, %v243_v48 }
  0x40   :  { %v306_v50 = vsel %vm260_vm0, %v259_v49, 0.0 }
  0x41   :  { %286 = vadd.xlane.f32.xlu2 %v285_v11  ;;  %283 = vadd.xlane.f32.xlu1 %v282_v13 }
  0x44   :  { %280 = vadd.xlane.f32.xlu0 %v279_v17 }
  0x49   :  { %295 = vadd.xlane.f32.xlu2 %v294_v32  ;;  %292 = vadd.xlane.f32.xlu1 %v291_v34 }
  0x4c   :  { %289 = vadd.xlane.f32.xlu0 %v288_v36 }
  0x51   :  { %304 = vadd.xlane.f32.xlu2 %v303_v45  ;;  %301 = vadd.xlane.f32.xlu1 %v300_v46 }
  0x54   :  { %298 = vadd.xlane.f32.xlu0 %v297_v47 }
  0x5c   :  { %307 = vadd.xlane.f32.xlu0 %v306_v50 }
  0xa4   :  { %v275_v51 = vpop.xlane.xlu2 %274  ;;  %v767_v52 = vpop.xlane.xlu1 %268 }
  0xa5   :  { %608 = vrsqrt.f32 %v275_v51  ;;  %vm364_vm2 = vcmp.eq.f32.partialorder %v275_v51, inf  ;;  %vm366_vm3 = vcmp.eq.f32.partialorder %v275_v51, 0.0  ;;  %v367_v5 = vand.u32 2147483648, %v275_v51 }
  0xa6   :  { %610 = vrsqrt.f32 %v767_v52  ;;  %vm340_vm4 = vcmp.eq.f32.partialorder %v767_v52, inf  ;;  %vm342_vm5 = vcmp.eq.f32.partialorder %v767_v52, 0.0  ;;  %v343_v9 = vand.u32 2147483648, %v767_v52 }
  0xa7   :  { %v770_v53 = vpop.xlane.xlu0 %262 }
  0xa8   :  { %612 = vrsqrt.f32 %v770_v53  ;;  %vm316_vm6 = vcmp.eq.f32.partialorder %v770_v53, inf  ;;  %vm318_vm7 = vcmp.eq.f32.partialorder %v770_v53, 0.0  ;;  %v319_v21 = vand.u32 2147483648, %v770_v53 }
  0xab   :  { %v609_v54 = vpop.eup %608 }
  0xac   :  { %v611_v55 = vpop.eup %610  ;;  %v358_v56 = vmul.f32 %v609_v54, %v275_v51  ;;  %v773_v57 = vpop.xlane.xlu2 %277 }
  0xad   :  { %v334_v59 = vmul.f32 %v611_v55, %v767_v52  ;;  %614 = vrsqrt.f32 %v773_v57  ;;  %v777_v60 = vpop.xlane.xlu1 %271  ;;  %vm376_vm8 = vcmp.eq.f32.partialorder %v773_v57, inf  ;;  %vm378_vm9 = vcmp.eq.f32.partialorder %v773_v57, 0.0 }
  0xae   :  { %v613_v58 = vpop.eup %612  ;;  %v359_v61 = vmul.f32 %v609_v54, %v358_v56  ;;  %616 = vrsqrt.f32 %v777_v60  ;;  %v379_v47 = vand.u32 2147483648, %v773_v57  ;;  %vm352_vm10 = vcmp.eq.f32.partialorder %v777_v60, inf }
  0xaf   :  { %v310_v62 = vmul.f32 %v613_v58, %v770_v53  ;;  %v781_v63 = vpop.xlane.xlu0 %265  ;;  %v335_v0 = vmul.f32 %v611_v55, %v334_v59  ;;  %vm354_vm11 = vcmp.eq.f32.partialorder %v777_v60, 0.0 }
  0xb0   :  { %v360_v1 = vmul.f32 0.5, %v359_v61  ;;  %618 = vrsqrt.f32 %v781_v63  ;;  %vm328_vm12 = vcmp.eq.f32.partialorder %v781_v63, inf  ;;  %vm330_vm13 = vcmp.eq.f32.partialorder %v781_v63, 0.0 }
  0xb1   :  { %v311_v2 = vmul.f32 %v613_v58, %v310_v62  ;;  %v336_v3 = vmul.f32 0.5, %v335_v0 }
  0xb2   :  { %v361_v4 = vsub.f32 1.5, %v360_v1 }
  0xb3   :  { %v312_v6 = vmul.f32 0.5, %v311_v2  ;;  %v615_v7 = vpop.eup %614  ;;  %v337_v8 = vsub.f32 1.5, %v336_v3 }
  0xb4   :  { %v617_v10 = vpop.eup %616  ;;  %v362_v11 = vmul.f32 %v609_v54, %v361_v4  ;;  %v370_v13 = vmul.f32 %v615_v7, %v773_v57  ;;  %v789_v14 = vpop.xlane.xlu2 %286 }
  0xb5   :  { %v313_v12 = vsub.f32 1.5, %v312_v6  ;;  %v338_v15 = vmul.f32 %v611_v55, %v337_v8  ;;  %v346_v16 = vmul.f32 %v617_v10, %v777_v60  ;;  %620 = vrsqrt.f32 %v789_v14  ;;  %v794_v17 = vpop.xlane.xlu1 %283 }
  0xb6   :  { %v619_v18 = vpop.eup %618  ;;  %v363_v19 = vmul.f32 %v362_v11, %v275_v51  ;;  %v371_v22 = vmul.f32 %v615_v7, %v370_v13  ;;  %622 = vrsqrt.f32 %v794_v17  ;;  %v355_v55 = vand.u32 2147483648, %v777_v60 }
  0xb7   :  { %v314_v20 = vmul.f32 %v613_v58, %v313_v12  ;;  %v797_v23 = vpop.xlane.xlu0 %280  ;;  %v339_v24 = vmul.f32 %v338_v15, %v767_v52  ;;  %v347_v25 = vmul.f32 %v617_v10, %v346_v16  ;;  %v322_v26 = vmul.f32 %v619_v18, %v781_v63 }
  0xb8   :  { %v365_v27 = vsel %vm364_vm2, %v275_v51, %v363_v19  ;;  %v372_v29 = vmul.f32 0.5, %v371_v22  ;;  %624 = vrsqrt.f32 %v797_v23  ;;  %v331_v6 = vand.u32 2147483648, %v781_v63 }
  0xb9   :  { %v315_v28 = vmul.f32 %v314_v20, %v770_v53  ;;  %v368_v30 = vsel %vm366_vm3, %v367_v5, %v365_v27  ;;  %v341_v31 = vsel %vm340_vm4, %v767_v52, %v339_v24  ;;  %v348_v32 = vmul.f32 0.5, %v347_v25 }
  0xba   :  { %v323_v33 = vmul.f32 %v619_v18, %v322_v26  ;;  %v505_v34 = vsub.f32 0.0, %v368_v30  ;;  %v344_v35 = vsel %vm342_vm5, %v343_v9, %v341_v31  ;;  %v373_v37 = vsub.f32 1.5, %v372_v29 }
  0xbb   :  { %v317_v36 = vsel %vm316_vm6, %v770_v53, %v315_v28  ;;  %v621_v38 = vpop.eup %620  ;;  %v503_v39 = vsub.f32 0.0, %v344_v35  ;;  %v349_v41 = vsub.f32 1.5, %v348_v32  ;;  %vm412_vm14 = vcmp.eq.f32.partialorder %v789_v14, inf }
  0xbc   :  { %v320_v40 = vsel %vm318_vm7, %v319_v21, %v317_v36  ;;  %v324_v42 = vmul.f32 0.5, %v323_v33  ;;  %522 = vst.msk [vmem:[%s1003_s5 + $0x20] sm:$0xff] %vm517_vm1, %v505_v34  ;;  %v374_v44 = vmul.f32 %v615_v7, %v373_v37  ;;  %v406_v45 = vmul.f32 %v621_v38, %v789_v14  ;;  %v822_v46 = vpop.xlane.xlu2 %295  ;;  %v623_v50 = vpop.eup %622 }
  0xbd   :  { %v501_v43 = vsub.f32 0.0, %v320_v40  ;;  %520 = vst.msk [vmem:[%s1003_s5 + $0x10] sm:$0xff] %vm517_vm1, %v503_v39  ;;  %v350_v48 = vmul.f32 %v617_v10, %v349_v41  ;;  %v394_v58 = vmul.f32 %v623_v50, %v794_v17  ;;  %v842_v59 = vpop.xlane.xlu1 %292  ;;  %626 = vrsqrt.f32 %v822_v46 }
  0xbe   :  { %v325_v49 = vsub.f32 1.5, %v324_v42  ;;  %v375_v51 = vmul.f32 %v374_v44, %v773_v57  ;;  %v407_v52 = vmul.f32 %v621_v38, %v406_v45  ;;  %v625_v10 = vpop.eup %624  ;;  %628 = vrsqrt.f32 %v842_v59 }
  0xbf   :  { %518 = vst.msk [vmem:[%s1003_s5] sm:$0xff] %vm517_vm1, %v501_v43  ;;  %v837_v53 = vpop.xlane.xlu0 %289  ;;  %v351_v54 = vmul.f32 %v350_v48, %v777_v60  ;;  %v395_v3 = vmul.f32 %v623_v50, %v394_v58  ;;  %v415_v20 = vand.u32 2147483648, %v789_v14  ;;  %vm414_vm15 = vcmp.eq.f32.partialorder %v789_v14, 0.0 }
  0xc0   :  { %v326_v56 = vmul.f32 %v619_v18, %v325_v49  ;;  %v377_v61 = vsel %vm376_vm8, %v773_v57, %v375_v51  ;;  %v408_v62 = vmul.f32 0.5, %v407_v52  ;;  %630 = vrsqrt.f32 %v837_v53 }
  0xc1   :  { %v380_v0 = vsel %vm378_vm9, %v379_v47, %v377_v61  ;;  %v353_v1 = vsel %vm352_vm10, %v777_v60, %v351_v54  ;;  %v396_v57 = vmul.f32 0.5, %v395_v3  ;;  %vm400_vm0 = vcmp.eq.f32.partialorder %v794_v17, inf }
  0xc2   :  { %v327_v2 = vmul.f32 %v326_v56, %v781_v63  ;;  %v506_v4 = vsub.f32 0.0, %v380_v0  ;;  %v356_v5 = vsel %vm354_vm11, %v355_v55, %v353_v1  ;;  %v409_v7 = vsub.f32 1.5, %v408_v62 }
  0xc3   :  { %v504_v8 = vsub.f32 0.0, %v356_v5  ;;  %v397_v13 = vsub.f32 1.5, %v396_v57  ;;  %v627_v16 = vpop.eup %626  ;;  %vm402_vm2 = vcmp.eq.f32.partialorder %v794_v17, 0.0  ;;  %v403_v33 = vand.u32 2147483648, %v794_v17 }
  0xc4   :  { %v329_v9 = vsel %vm328_vm12, %v781_v63, %v327_v2  ;;  %523 = vst.msk [vmem:[%s1003_s5 + $0x28] sm:$0xff] %vm517_vm1, %v506_v4  ;;  %v410_v12 = vmul.f32 %v621_v38, %v409_v7  ;;  %v382_v63 = vmul.f32 %v625_v10, %v797_v23  ;;  %v870_v15 = vpop.xlane.xlu2 %304  ;;  %v442_v24 = vmul.f32 %v627_v16, %v822_v46  ;;  %v629_v31 = vpop.eup %628 }
  0xc5   :  { %v332_v11 = vsel %vm330_vm13, %v331_v6, %v329_v9  ;;  %521 = vst.msk [vmem:[%s1003_s5 + $0x18] sm:$0xff] %vm517_vm1, %v504_v8  ;;  %v398_v21 = vmul.f32 %v623_v50, %v397_v13  ;;  %632 = vrsqrt.f32 %v870_v15  ;;  %v888_v30 = vpop.xlane.xlu1 %301  ;;  %vm388_vm3 = vcmp.eq.f32.partialorder %v797_v23, inf }
  0xc6   :  { %v502_v60 = vsub.f32 0.0, %v332_v11  ;;  %v411_v18 = vmul.f32 %v410_v12, %v789_v14  ;;  %v383_v22 = vmul.f32 %v625_v10, %v382_v63  ;;  %v443_v29 = vmul.f32 %v627_v16, %v442_v24  ;;  %v631_v37 = vpop.eup %630 }
  0xc7   :  { %v875_v19 = vpop.xlane.xlu0 %298  ;;  %v399_v27 = vmul.f32 %v398_v21, %v794_v17  ;;  %v430_v36 = vmul.f32 %v629_v31, %v842_v59  ;;  %vm390_vm4 = vcmp.eq.f32.partialorder %v797_v23, 0.0  ;;  %v391_v39 = vand.u32 2147483648, %v797_v23 }
  0xc8   :  { %519 = vst.msk [vmem:[%s1003_s5 + $0x8] sm:$0xff] %vm517_vm1, %v502_v60  ;;  %v413_v25 = vsel %vm412_vm14, %v789_v14, %v411_v18  ;;  %v384_v28 = vmul.f32 0.5, %v383_v22  ;;  %v444_v35 = vmul.f32 0.5, %v443_v29  ;;  %634 = vrsqrt.f32 %v888_v30 }
  0xc9   :  { %v416_v26 = vsel %vm414_vm15, %v415_v20, %v413_v25  ;;  %v401_v14 = vsel %vm400_vm0, %v794_v17, %v399_v27  ;;  %v431_v42 = vmul.f32 %v629_v31, %v430_v36  ;;  %vm448_vm5 = vcmp.eq.f32.partialorder %v822_v46, inf }
  0xca   :  { %v509_v32 = vsub.f32 0.0, %v416_v26  ;;  %v385_v34 = vsub.f32 1.5, %v384_v28  ;;  %v404_v38 = vsel %vm402_vm2, %v403_v33, %v401_v14  ;;  %v445_v17 = vsub.f32 1.5, %v444_v35 }
  0xcb   :  { %v508_v40 = vsub.f32 0.0, %v404_v38  ;;  %v633_v43 = vpop.eup %632  ;;  %vm450_vm6 = vcmp.eq.f32.partialorder %v822_v46, 0.0  ;;  %v418_v44 = vmul.f32 %v631_v37, %v837_v53  ;;  %636 = vrsqrt.f32 %v875_v19 }
  0xcc   :  { %526 = vst.msk [vmem:[%s1003_s5 + $0x40] sm:$0xff] %vm517_vm1, %v509_v32  ;;  %v386_v41 = vmul.f32 %v625_v10, %v385_v34  ;;  %v446_v48 = vmul.f32 %v627_v16, %v445_v17  ;;  %v432_v49 = vmul.f32 0.5, %v431_v42  ;;  %v478_v50 = vmul.f32 %v633_v43, %v870_v15 }
  0xcd   :  { %525 = vst.msk [vmem:[%s1003_s5 + $0x38] sm:$0xff] %vm517_vm1, %v508_v40  ;;  %v451_v51 = vand.u32 2147483648, %v822_v46  ;;  %vm436_vm7 = vcmp.eq.f32.partialorder %v842_v59, inf  ;;  %v419_v52 = vmul.f32 %v631_v37, %v418_v44  ;;  %vm438_vm8 = vcmp.eq.f32.partialorder %v842_v59, 0.0 }
  0xce   :  { %v387_v47 = vmul.f32 %v386_v41, %v797_v23  ;;  %v447_v55 = vmul.f32 %v446_v48, %v822_v46  ;;  %v433_v56 = vsub.f32 1.5, %v432_v49  ;;  %v479_v58 = vmul.f32 %v633_v43, %v478_v50  ;;  %v635_v61 = vpop.eup %634 }
  0xcf   :  { %v906_v45 = vpop.xlane.xlu0 %307  ;;  %v439_v0 = vand.u32 2147483648, %v842_v59  ;;  %v420_v1 = vmul.f32 0.5, %v419_v52  ;;  %vm424_vm9 = vcmp.eq.f32.partialorder %v837_v53, inf  ;;  %vm426_vm10 = vcmp.eq.f32.partialorder %v837_v53, 0.0 }
  0xd0   :  { %638 = vrsqrt.f32 %v906_v45  ;;  %v389_v54 = vsel %vm388_vm3, %v797_v23, %v387_v47  ;;  %v449_v3 = vsel %vm448_vm5, %v822_v46, %v447_v55  ;;  %v434_v4 = vmul.f32 %v629_v31, %v433_v56 }
  0xd1   :  { %v392_v62 = vsel %vm390_vm4, %v391_v39, %v389_v54  ;;  %v480_v5 = vmul.f32 0.5, %v479_v58  ;;  %v637_v6 = vpop.eup %636  ;;  %v452_v7 = vsel %vm450_vm6, %v451_v51, %v449_v3  ;;  %v421_v8 = vsub.f32 1.5, %v420_v1 }
  0xd2   :  { %v507_v2 = vsub.f32 0.0, %v392_v62  ;;  %v466_v23 = vmul.f32 %v635_v61, %v888_v30  ;;  %v512_v9 = vsub.f32 0.0, %v452_v7  ;;  %v435_v57 = vmul.f32 %v434_v4, %v842_v59 }
  0xd3   :  { %v481_v10 = vsub.f32 1.5, %v480_v5  ;;  %v454_v11 = vmul.f32 %v637_v6, %v875_v19  ;;  %v422_v60 = vmul.f32 %v631_v37, %v421_v8  ;;  %v427_v46 = vand.u32 2147483648, %v837_v53 }
  0xd4   :  { %524 = vst.msk [vmem:[%s1003_s5 + $0x30] sm:$0xff] %vm517_vm1, %v507_v2  ;;  %v467_v13 = vmul.f32 %v635_v61, %v466_v23  ;;  %v437_v63 = vsel %vm436_vm7, %v842_v59, %v435_v57  ;;  %vm484_vm11 = vcmp.eq.f32.partialorder %v870_v15, inf  ;;  %vm486_vm12 = vcmp.eq.f32.partialorder %v870_v15, 0.0 }
  0xd5   :  { %529 = vst.msk [vmem:[%s1003_s5 + $0x58] sm:$0xff] %vm517_vm1, %v512_v9  ;;  %v482_v16 = vmul.f32 %v633_v43, %v481_v10  ;;  %v455_v18 = vmul.f32 %v637_v6, %v454_v11  ;;  %v440_v21 = vsel %vm438_vm8, %v439_v0, %v437_v63  ;;  %v423_v22 = vmul.f32 %v422_v60, %v837_v53 }
  0xd6   :  { %v639_v12 = vpop.eup %638  ;;  %v468_v24 = vmul.f32 0.5, %v467_v13  ;;  %v511_v25 = vsub.f32 0.0, %v440_v21  ;;  %v487_v31 = vand.u32 2147483648, %v870_v15  ;;  %vm472_vm13 = vcmp.eq.f32.partialorder %v888_v30, inf }
  0xd7   :  { %v490_v20 = vmul.f32 %v639_v12, %v906_v45  ;;  %v483_v26 = vmul.f32 %v482_v16, %v870_v15  ;;  %v456_v27 = vmul.f32 0.5, %v455_v18  ;;  %v425_v29 = vsel %vm424_vm9, %v837_v53, %v423_v22 }
  0xd8   :  { %v469_v59 = vsub.f32 1.5, %v468_v24  ;;  %528 = vst.msk [vmem:[%s1003_s5 + $0x50] sm:$0xff] %vm517_vm1, %v511_v25  ;;  %v428_v32 = vsel %vm426_vm10, %v427_v46, %v425_v29  ;;  %v475_v53 = vand.u32 2147483648, %v888_v30  ;;  %vm474_vm14 = vcmp.eq.f32.partialorder %v888_v30, 0.0 }
  0xd9   :  { %v491_v28 = vmul.f32 %v639_v12, %v490_v20  ;;  %v485_v33 = vsel %vm484_vm11, %v870_v15, %v483_v26  ;;  %v457_v14 = vsub.f32 1.5, %v456_v27  ;;  %v510_v35 = vsub.f32 0.0, %v428_v32 }
  0xda   :  { %v488_v36 = vsel %vm486_vm12, %v487_v31, %v485_v33  ;;  %v470_v37 = vmul.f32 %v635_v61, %v469_v59  ;;  %vm460_vm15 = vcmp.eq.f32.partialorder %v875_v19, inf  ;;  %v463_v43 = vand.u32 2147483648, %v875_v19 }
  0xdb   :  { %v492_v34 = vmul.f32 0.5, %v491_v28  ;;  %v515_v38 = vsub.f32 0.0, %v488_v36  ;;  %v458_v39 = vmul.f32 %v637_v6, %v457_v14  ;;  %527 = vst.msk [vmem:[%s1003_s5 + $0x48] sm:$0xff] %vm517_vm1, %v510_v35  ;;  %vm462_vm0 = vcmp.eq.f32.partialorder %v875_v19, 0.0 }
  0xdc   :  { %v471_v41 = vmul.f32 %v470_v37, %v888_v30  ;;  %vm496_vm2 = vcmp.eq.f32.partialorder %v906_v45, inf  ;;  %v499_v51 = vand.u32 2147483648, %v906_v45  ;;  %vm498_vm3 = vcmp.eq.f32.partialorder %v906_v45, 0.0 }
  0xdd   :  { %v493_v40 = vsub.f32 1.5, %v492_v34  ;;  %532 = vst.msk [vmem:[%s1003_s5 + $0x70] sm:$0xff] %vm517_vm1, %v515_v38  ;;  %v459_v15 = vmul.f32 %v458_v39, %v875_v19 }
  0xde   :  { %v473_v42 = vsel %vm472_vm13, %v888_v30, %v471_v41 }
  0xdf   :  { %v494_v17 = vmul.f32 %v639_v12, %v493_v40  ;;  %v476_v44 = vsel %vm474_vm14, %v475_v53, %v473_v42  ;;  %v461_v47 = vsel %vm460_vm15, %v875_v19, %v459_v15 }
  0xe0   :  { %v514_v49 = vsub.f32 0.0, %v476_v44  ;;  %v464_v50 = vsel %vm462_vm0, %v463_v43, %v461_v47 }
  0xe1   :  { %v495_v48 = vmul.f32 %v494_v17, %v906_v45  ;;  %v513_v52 = vsub.f32 0.0, %v464_v50 }
  0xe2   :  { %531 = vst.msk [vmem:[%s1003_s5 + $0x68] sm:$0xff] %vm517_vm1, %v514_v49 }
  0xe3   :  { %v497_v30 = vsel %vm496_vm2, %v906_v45, %v495_v48  ;;  %530 = vst.msk [vmem:[%s1003_s5 + $0x60] sm:$0xff] %vm517_vm1, %v513_v52 }
  0xe4   :  { %v500_v54 = vsel %vm498_vm3, %v499_v51, %v497_v30 }
  0xe5   :  { %v516_v19 = vsub.f32 0.0, %v500_v54 }
  0xe7   :  { %533 = vst.msk [vmem:[%s1003_s5 + $0x78] sm:$0xff] %vm517_vm1, %v516_v19 }
  0xe8   :  { %538 = vsyncmov [#allocation5] }
  0xeb   :  { %s539_s19 = vpop.sfrf %538 }
  0xec   :  { %p586_p2 = scmp.ne.s32.totalorder %s539_s19, 0 }
  0xee   :  { %543 = shalt.err (%p586_p2)  }
  0xef   :  { %545 = vsyncmov [#allocation5 + $0x1] }
  0xf2   :  { %s546_s20 = vpop.sfrf %545 }
  0xf3   :  { %p587_p3 = scmp.ne.s32.totalorder %s546_s20, 0 }
  0xf5   :  { %550 = shalt.err (%p587_p3)  }
  0xf6   :  { %552 = vsyncmov [#allocation5 + $0x2] }
  0xf9   :  { %s553_s21 = vpop.sfrf %552 }
  0xfa   :  { %p588_p4 = scmp.ne.s32.totalorder %s553_s21, 0 }
  0xfc   :  { %557 = shalt.err (%p588_p4)  }

</bundles_post_ra>
